<compile_context>
chip_gen: v7x
topology: tpu7x:2x2x1
jax: 0.10.0
libtpu: 0.0.40
codegen_flags: <defaults>
</compile_context>

<pallas_src>
import functools

import jax
import jax.numpy as jnp
from jax.experimental import pallas as pl
from jax.experimental.pallas import tpu as pltpu

# Deterministic "hyper-parameters" of the loss (no learnable weights exist in
# the module's __init__).
START_LR = 1e-3
START_PREF_E = 0.02
LIMIT_PREF_E = 1.0
START_PREF_F = 1000.0
LIMIT_PREF_F = 1.0

LANES = 128
OUT_SUBLANES = 8
# Below this many force elements the pallas_call launch/DMA overhead dominates;
# fall back to a fused XLA reduction (the tests force the Pallas path anyway).
_PALLAS_MIN_FORCE_ELEMS = 16384


def _round_up(x, m):
    return (x + m - 1) // m * m


def _sublane_multiple(dtype):
    # f32 -> 8, bf16/f16 -> 16, int8/fp8 -> 32 (dtype sublane packing).
    return {4: 8, 2: 16, 1: 32}.get(jnp.dtype(dtype).itemsize, 8)


def _task_loss_kernel(lr_ref, natoms_ref,
                      e_pred_ref, e_lab_ref, f_pred_ref, f_lab_ref,
                      out_ref, f_acc_ref,
                      *, n_rows, n_cols, tb, tc,
                      need_row_mask, need_col_mask,
                      e_inv_count, f_inv_count):
    i = pl.program_id(0)
    j = pl.program_id(1)
    last_i = pl.num_programs(0) - 1
    last_j = pl.num_programs(1) - 1

    @pl.when(jnp.logical_and(i == 0, j == 0))
    def _init():
        f_acc_ref[...] = jnp.zeros_like(f_acc_ref)

    # ---- hot path: per-tile force squared error (pure stream + VPU) --------
    df = (f_pred_ref[...].astype(jnp.float32)
          - f_lab_ref[...].astype(jnp.float32))
    if need_row_mask or need_col_mask:
        valid = None
        if need_row_mask:
            rows = i * tb + jax.lax.broadcasted_iota(jnp.int32, (tb, tc), 0)
            valid = rows < n_rows
        if need_col_mask:
            cols = j * tc + jax.lax.broadcasted_iota(jnp.int32, (tb, tc), 1)
            cmask = cols < n_cols
            valid = cmask if valid is None else jnp.logical_and(valid, cmask)
        # where() is a select: garbage in the out-of-bounds block region
        # (unspecified values) cannot contaminate the sum.
        df = jnp.where(valid, df, jnp.float32(0.0))
    f_acc_ref[...] += jnp.sum(df * df, axis=0, keepdims=True)

    @pl.when(jnp.logical_and(i == last_i, j == last_j))
    def _finalize():
        lr = lr_ref[0]
        nat = natoms_ref[0].astype(jnp.float32)

        # Energy blocks are resident (constant index map) and tiny; reduce once.
        de = (e_pred_ref[...].astype(jnp.float32)
              - e_lab_ref[...].astype(jnp.float32))
        l2_e = jnp.sum(de * de) * jnp.float32(e_inv_count)
        l2_f = jnp.sum(f_acc_ref[...]) * jnp.float32(f_inv_count)

        coef = lr * jnp.float32(1.0 / START_LR)
        pref_e = jnp.float32(LIMIT_PREF_E) + jnp.float32(START_PREF_E - LIMIT_PREF_E) * coef
        pref_f = jnp.float32(LIMIT_PREF_F) + jnp.float32(START_PREF_F - LIMIT_PREF_F) * coef

        loss = (pref_e * l2_e) / nat + pref_f * l2_f
        rmse_e = jnp.sqrt(l2_e) / nat
        rmse_f = jnp.sqrt(l2_f)

        # Single lane-dense output tile: lanes 0/1/2 = loss / rmse_e / rmse_f.
        lane = jax.lax.broadcasted_iota(jnp.int32, out_ref.shape, 1)
        out_ref[...] = jnp.where(
            lane == 0, loss,
            jnp.where(lane == 1, rmse_e,
                      jnp.where(lane == 2, rmse_f, jnp.float32(0.0))))


def _task_loss_jnp(e_pred, e_lab, f_pred, f_lab, natoms, learning_rate):
    """Pure-JAX reference / small-input fallback."""
    coef = jnp.asarray(learning_rate, jnp.float32) / jnp.float32(START_LR)
    pref_e = jnp.float32(LIMIT_PREF_E) + jnp.float32(START_PREF_E - LIMIT_PREF_E) * coef
    pref_f = jnp.float32(LIMIT_PREF_F) + jnp.float32(START_PREF_F - LIMIT_PREF_F) * coef
    nat = jnp.asarray(natoms).reshape(-1)[0].astype(jnp.float32)
    l2_e = jnp.mean(jnp.square(e_pred.astype(jnp.float32) - e_lab.astype(jnp.float32)))
    l2_f = jnp.mean(jnp.square(f_pred.astype(jnp.float32) - f_lab.astype(jnp.float32)))
    loss = (pref_e * l2_e) / nat + pref_f * l2_f
    return loss, {"rmse_e": jnp.sqrt(l2_e) / nat, "rmse_f": jnp.sqrt(l2_f)}


def task_loss(model_pred, label, natoms, learning_rate, *,
              row_tile=None, col_tile=None, use_pallas=None):
    """EnergyStdLoss-style forward.

    model_pred / label: dicts with 'energy' [B, 1] and 'force' [B, natoms*3]
    (any float dtype; widened to f32 inside the kernel).
    natoms: int vector with natoms[0] = nloc.  learning_rate: scalar.
    Returns (loss, {'rmse_e', 'rmse_f'}) as f32 scalars.
    """
    e_pred = jnp.asarray(model_pred["energy"])
    e_lab = jnp.asarray(label["energy"])
    f_pred = jnp.asarray(model_pred["force"])
    f_lab = jnp.asarray(label["force"])

    e_count = int(e_pred.size)
    f_count = int(f_pred.size)

    if use_pallas is None:
        use_pallas = f_count >= _PALLAS_MIN_FORCE_ELEMS
    if not use_pallas:
        return _task_loss_jnp(e_pred, e_lab, f_pred, f_lab, natoms, learning_rate)

    # --- zero-copy layout: row-major reshape to 2-D only (no jnp.pad pass) ---
    e_pred2 = e_pred.reshape(e_pred.shape[0], -1)
    e_lab2 = e_lab.reshape(e_lab.shape[0], -1)
    f_pred2 = f_pred.reshape(f_pred.shape[0], -1)
    f_lab2 = f_lab.reshape(f_lab.shape[0], -1)

    B, K = f_pred2.shape
    itemsize = jnp.dtype(f_pred2.dtype).itemsize
    sub = _sublane_multiple(f_pred2.dtype)
    Kp = _round_up(K, LANES)

    # Per-generation VMEM scoping: ~64 MiB on v5e/v6e (128 MiB physical),
    # ~32 MiB on v7x (64 MiB physical).
    try:
        vmem_cap = int(pltpu.get_tpu_info().vmem_capacity_bytes)
    except Exception:
        vmem_cap = 128 * 1024 * 1024
    vmem_limit = min(64 * 1024 * 1024, max(32 * 1024 * 1024, vmem_cap // 2))

    # Per force-input block budget (2 inputs x 2 pipeline buffers must fit
    # comfortably inside the scoped limit): 2-8 MiB per block.
    block_budget = max(2 << 20, min(8 << 20, vmem_limit // 8))

    if col_tile is not None:
        tc = max(LANES, _round_up(int(col_tile), LANES))
    elif sub * Kp * itemsize <= block_budget:
        tc = Kp                      # whole row per block -> contiguous DMA rows
    else:
        tc = max(LANES, (block_budget // (sub * itemsize)) // LANES * LANES)
    tc = min(tc, Kp)

    if row_tile is not None:
        tb = max(sub, _round_up(int(row_tile), sub))
    else:
        tb = max(sub, (block_budget // (tc * itemsize)) // sub * sub)
    tb = min(tb, _round_up(B, sub))

    grid = (pl.cdiv(B, tb), pl.cdiv(K, tc))
    need_row_mask = grid[0] * tb > B
    need_col_mask = grid[1] * tc > K

    lr_arr = jnp.asarray(learning_rate, jnp.float32).reshape(1)
    natoms_arr = jnp.asarray(natoms, jnp.int32).reshape(-1)

    kernel = functools.partial(
        _task_loss_kernel,
        n_rows=B, n_cols=K, tb=tb, tc=tc,
        need_row_mask=bool(need_row_mask), need_col_mask=bool(need_col_mask),
        e_inv_count=1.0 / float(e_count),   # exact host-side double reciprocal
        f_inv_count=1.0 / float(f_count))

    bytes_accessed = (
        (e_pred2.size + e_lab2.size) * e_pred2.dtype.itemsize
        + (f_pred2.size + f_lab2.size) * itemsize
        + lr_arr.size * 4 + natoms_arr.size * 4
        + OUT_SUBLANES * LANES * 4)

    out = pl.pallas_call(
        kernel,
        out_shape=jax.ShapeDtypeStruct((OUT_SUBLANES, LANES), jnp.float32),
        grid_spec=pltpu.PrefetchScalarGridSpec(
            num_scalar_prefetch=0,
            grid=grid,
            in_specs=[
                pl.BlockSpec(memory_space=pltpu.MemorySpace.SMEM),   # learning rate
                pl.BlockSpec(memory_space=pltpu.MemorySpace.SMEM),   # natoms
                pl.BlockSpec(e_pred2.shape, lambda i, j: (0, 0)),    # energy pred (resident)
                pl.BlockSpec(e_lab2.shape, lambda i, j: (0, 0)),     # energy label (resident)
                pl.BlockSpec((tb, tc), lambda i, j: (i, j)),         # force pred tile
                pl.BlockSpec((tb, tc), lambda i, j: (i, j)),         # force label tile
            ],
            out_specs=pl.BlockSpec((OUT_SUBLANES, LANES), lambda i, j: (0, 0)),
            scratch_shapes=[pltpu.VMEM((1, tc), jnp.float32)],       # per-lane force accum
        ),
        compiler_params=pltpu.CompilerParams(
            dimension_semantics=("arbitrary", "arbitrary"),          # reduction axes, resident out
            vmem_limit_bytes=int(vmem_limit),
        ),
        cost_estimate=pl.CostEstimate(
            flops=3 * (e_count + f_count),
            transcendentals=2,
            bytes_accessed=int(bytes_accessed),
        ),
    )(lr_arr, natoms_arr, e_pred2, e_lab2, f_pred2, f_lab2)

    return out[0, 0], {"rmse_e": out[0, 1], "rmse_f": out[0, 2]}


if __name__ == "__main__":
    key = jax.random.PRNGKey(0)

    def make_inputs(k, batch, n_atoms, dtype=jnp.float32):
        k1, k2, k3, k4 = jax.random.split(k, 4)
        model_pred = {
            "energy": jax.random.normal(k1, (batch, 1), dtype),
            "force": jax.random.normal(k2, (batch, n_atoms * 3), dtype),
        }
        label = {
            "energy": jax.random.normal(k3, (batch, 1), dtype),
            "force": jax.random.normal(k4, (batch, n_atoms * 3), dtype),
        }
        natoms = jnp.array([n_atoms, n_atoms, n_atoms], jnp.int32)
        return model_pred, label, natoms

    lr = 5e-4
    k_a, k_b, k_c = jax.random.split(key, 3)

    # 1) Tiny shapes (single grid step, row + column edge masking), Pallas forced.
    mp, lb, natoms = make_inputs(k_a, batch=2, n_atoms=8)
    loss, more = task_loss(mp, lb, natoms, lr, use_pallas=True)
    jax.block_until_ready((loss, more))
    ref_loss, ref_more = _task_loss_jnp(mp["energy"], lb["energy"],
                                        mp["force"], lb["force"], natoms, lr)
    assert jnp.allclose(loss, ref_loss, rtol=1e-4, atol=1e-3), (loss, ref_loss)
    assert jnp.allclose(more["rmse_e"], ref_more["rmse_e"], rtol=1e-4, atol=1e-5)
    assert jnp.allclose(more["rmse_f"], ref_more["rmse_f"], rtol=1e-4, atol=1e-5)

    # 2) Multi-tile grid (tiny explicit tiles to exercise the running
    #    accumulator + ragged last column tile).
    mp2, lb2, natoms2 = make_inputs(k_b, batch=2, n_atoms=400)
    loss2, more2 = task_loss(mp2, lb2, natoms2, lr,
                             use_pallas=True, row_tile=8, col_tile=128)
    jax.block_until_ready((loss2, more2))
    ref_loss2, ref_more2 = _task_loss_jnp(mp2["energy"], lb2["energy"],
                                          mp2["force"], lb2["force"], natoms2, lr)
    assert jnp.allclose(loss2, ref_loss2, rtol=1e-4, atol=1e-3), (loss2, ref_loss2)
    assert jnp.allclose(more2["rmse_e"], ref_more2["rmse_e"], rtol=1e-4, atol=1e-5)
    assert jnp.allclose(more2["rmse_f"], ref_more2["rmse_f"], rtol=1e-4, atol=1e-5)

    # 3) bf16 inputs (16-sublane rounding, in-kernel widening to f32).
    mp3, lb3, natoms3 = make_inputs(k_c, batch=4, n_atoms=300, dtype=jnp.bfloat16)
    loss3, more3 = task_loss(mp3, lb3, natoms3, lr, use_pallas=True)
    jax.block_until_ready((loss3, more3))
    ref_loss3, ref_more3 = _task_loss_jnp(mp3["energy"], lb3["energy"],
                                          mp3["force"], lb3["force"], natoms3, lr)
    assert jnp.allclose(loss3, ref_loss3, rtol=1e-3, atol=1e-2), (loss3, ref_loss3)
    assert jnp.allclose(more3["rmse_e"], ref_more3["rmse_e"], rtol=1e-3, atol=1e-4)
    assert jnp.allclose(more3["rmse_f"], ref_more3["rmse_f"], rtol=1e-3, atol=1e-4)

    assert jnp.isfinite(loss) and jnp.isfinite(loss2) and jnp.isfinite(loss3)
    print("KERNEL_OK")
</pallas_src>

<mosaic_0001>
module attributes {stable_mosaic.version = 11 : i64} {
  func.func @_task_loss_kernel(%arg0: i32, %arg1: i32, %arg2: memref<1xf32, #tpu.memory_space<smem>>, %arg3: memref<3xi32, #tpu.memory_space<smem>>, %arg4: memref<2x1xf32, #tpu.memory_space<vmem>>, %arg5: memref<2x1xf32, #tpu.memory_space<vmem>>, %arg6: memref<8x128xf32, #tpu.memory_space<vmem>>, %arg7: memref<8x128xf32, #tpu.memory_space<vmem>>, %arg8: memref<8x128xf32, #tpu.memory_space<vmem>>, %arg9: memref<1x128xf32, #tpu.memory_space<vmem>>) attributes {dimension_semantics = [#tpu.dimension_semantics<arbitrary>, #tpu.dimension_semantics<arbitrary>], iteration_bounds = array<i64: 1, 1>, scalar_prefetch = 0 : i64, scratch_operands = 1 : i64, tpu.core_type = #tpu.core_type<tc>, window_params = [{transform_indices = @transform_0, window_bounds = array<i64: 1>}, {transform_indices = @transform_1, window_bounds = array<i64: 3>}, {pipeline_mode = #tpu.pipeline_mode<synchronous>, transform_indices = @transform_2, window_bounds = array<i64: 2, 1>}, {pipeline_mode = #tpu.pipeline_mode<synchronous>, transform_indices = @transform_3, window_bounds = array<i64: 2, 1>}, {transform_indices = @transform_4, window_bounds = array<i64: 8, 128>}, {transform_indices = @transform_5, window_bounds = array<i64: 8, 128>}, {pipeline_mode = #tpu.pipeline_mode<synchronous>, transform_indices = @transform_6, window_bounds = array<i64: 8, 128>}]} {
    %c0_i32 = arith.constant 0 : i32
    %0 = arith.cmpi eq, %arg0, %c0_i32 : i32
    %c0_i32_0 = arith.constant 0 : i32
    %1 = arith.cmpi eq, %arg1, %c0_i32_0 : i32
    %2 = arith.andi %0, %1 : i1
    %3 = arith.extui %2 : i1 to i32
    %c0_i32_1 = arith.constant 0 : i32
    %4 = arith.cmpi ne, %3, %c0_i32_1 : i32
    scf.if %4 {
      %cst_13 = arith.constant 0.000000e+00 : f32
      %34 = vector.broadcast %cst_13 : f32 to vector<1x128xf32>
      %c0_14 = arith.constant 0 : index
      %c0_15 = arith.constant 0 : index
      %35 = vector.load %arg9[%c0_14, %c0_15] : memref<1x128xf32, #tpu.memory_space<vmem>>, vector<1x128xf32>
      tpu.vector_store %arg9[%c0_14, %c0_15], %34 {strides = array<i32>} : memref<1x128xf32, #tpu.memory_space<vmem>>, vector<1x128xf32>,
    } else {
    }
    %c0 = arith.constant 0 : index
    %c0_2 = arith.constant 0 : index
    %5 = vector.load %arg6[%c0, %c0_2] : memref<8x128xf32, #tpu.memory_space<vmem>>, vector<8x128xf32>
    %c0_3 = arith.constant 0 : index
    %c0_4 = arith.constant 0 : index
    %6 = vector.load %arg7[%c0_3, %c0_4] : memref<8x128xf32, #tpu.memory_space<vmem>>, vector<8x128xf32>
    %7 = arith.subf %5, %6 : vector<8x128xf32>
    %c8_i32 = arith.constant 8 : i32
    %8 = arith.muli %arg0, %c8_i32 : i32
    %9 = tpu.iota {dimensions = array<i32: 0>} : vector<8x128xi32>
    %10 = vector.broadcast %8 : i32 to vector<8x128xi32>
    %11 = arith.addi %10, %9 : vector<8x128xi32>
    %c2_i32 = arith.constant 2 : i32
    %12 = vector.broadcast %c2_i32 : i32 to vector<8x128xi32>
    %13 = arith.cmpi slt, %11, %12 : vector<8x128xi32>
    %c128_i32 = arith.constant 128 : i32
    %14 = arith.muli %arg1, %c128_i32 : i32
    %15 = tpu.iota {dimensions = array<i32: 1>} : vector<8x128xi32>
    %16 = vector.broadcast %14 : i32 to vector<8x128xi32>
    %17 = arith.addi %16, %15 : vector<8x128xi32>
    %c24_i32 = arith.constant 24 : i32
    %18 = vector.broadcast %c24_i32 : i32 to vector<8x128xi32>
    %19 = arith.cmpi slt, %17, %18 : vector<8x128xi32>
    %20 = arith.andi %13, %19 : vector<8x128xi1>
    %cst = arith.constant 0.000000e+00 : f32
    %21 = vector.broadcast %cst : f32 to vector<8x128xf32>
    %22 = arith.select %20, %7, %21 : vector<8x128xi1>, vector<8x128xf32>
    %c0_5 = arith.constant 0 : index
    %c0_6 = arith.constant 0 : index
    %23 = vector.load %arg9[%c0_5, %c0_6] : memref<1x128xf32, #tpu.memory_space<vmem>>, vector<1x128xf32>
    %24 = arith.mulf %22, %22 : vector<8x128xf32>
    %cst_7 = arith.constant dense<0.000000e+00> : vector<128xf32>
    %25 = vector.multi_reduction <add>, %24, %cst_7 [0] : vector<8x128xf32> to vector<128xf32>
    %26 = vector.shape_cast %25 : vector<128xf32> to vector<1x128xf32>
    %27 = arith.addf %23, %26 : vector<1x128xf32>
    %c0_8 = arith.constant 0 : index
    %c0_9 = arith.constant 0 : index
    %28 = vector.load %arg9[%c0_8, %c0_9] : memref<1x128xf32, #tpu.memory_space<vmem>>, vector<1x128xf32>
    tpu.vector_store %arg9[%c0_8, %c0_9], %27 {strides = array<i32>} : memref<1x128xf32, #tpu.memory_space<vmem>>, vector<1x128xf32>,
    %c0_i32_10 = arith.constant 0 : i32
    %29 = arith.cmpi eq, %arg0, %c0_i32_10 : i32
    %c0_i32_11 = arith.constant 0 : i32
    %30 = arith.cmpi eq, %arg1, %c0_i32_11 : i32
    %31 = arith.andi %29, %30 : i1
    %32 = arith.extui %31 : i1 to i32
    %c0_i32_12 = arith.constant 0 : i32
    %33 = arith.cmpi ne, %32, %c0_i32_12 : i32
    scf.if %33 {
      %c0_13 = arith.constant 0 : index
      %34 = memref.load %arg2[%c0_13] : memref<1xf32, #tpu.memory_space<smem>>
      %c0_14 = arith.constant 0 : index
      %35 = memref.load %arg3[%c0_14] : memref<3xi32, #tpu.memory_space<smem>>
      %36 = arith.sitofp %35 : i32 to f32
      %c0_15 = arith.constant 0 : index
      %c0_16 = arith.constant 0 : index
      %37 = vector.load %arg4[%c0_15, %c0_16] : memref<2x1xf32, #tpu.memory_space<vmem>>, vector<2x1xf32>
      %c0_17 = arith.constant 0 : index
      %c0_18 = arith.constant 0 : index
      %38 = vector.load %arg5[%c0_17, %c0_18] : memref<2x1xf32, #tpu.memory_space<vmem>>, vector<2x1xf32>
      %39 = arith.subf %37, %38 : vector<2x1xf32>
      %40 = arith.mulf %39, %39 : vector<2x1xf32>
      %41 = vector.shape_cast %40 : vector<2x1xf32> to vector<1x2x1xf32>
      %cst_19 = arith.constant dense<0.000000e+00> : vector<1xf32>
      %42 = vector.multi_reduction <add>, %41, %cst_19 [1, 2] : vector<1x2x1xf32> to vector<1xf32>
      %43 = vector.shape_cast %42 : vector<1xf32> to vector<1x1x1xf32>
      %44 = vector.extract %43[0, 0, 0] : f32 from vector<1x1x1xf32>
      %cst_20 = arith.constant 5.000000e-01 : f32
      %45 = arith.mulf %44, %cst_20 : f32
      %c0_21 = arith.constant 0 : index
      %c0_22 = arith.constant 0 : index
      %46 = vector.load %arg9[%c0_21, %c0_22] : memref<1x128xf32, #tpu.memory_space<vmem>>, vector<1x128xf32>
      %47 = vector.shape_cast %46 : vector<1x128xf32> to vector<1x1x128xf32>
      %cst_23 = arith.constant dense<0.000000e+00> : vector<1xf32>
      %48 = vector.multi_reduction <add>, %47, %cst_23 [1, 2] : vector<1x1x128xf32> to vector<1xf32>
      %49 = vector.shape_cast %48 : vector<1xf32> to vector<1x1x1xf32>
      %50 = vector.extract %49[0, 0, 0] : f32 from vector<1x1x1xf32>
      %cst_24 = arith.constant 0.020833334 : f32
      %51 = arith.mulf %50, %cst_24 : f32
      %cst_25 = arith.constant 1.000000e+03 : f32
      %52 = arith.mulf %34, %cst_25 : f32
      %cst_26 = arith.constant -9.800000e-01 : f32
      %53 = arith.mulf %cst_26, %52 : f32
      %cst_27 = arith.constant 1.000000e+00 : f32
      %54 = arith.addf %cst_27, %53 : f32
      %cst_28 = arith.constant 9.990000e+02 : f32
      %55 = arith.mulf %cst_28, %52 : f32
      %cst_29 = arith.constant 1.000000e+00 : f32
      %56 = arith.addf %cst_29, %55 : f32
      %57 = arith.mulf %54, %45 : f32
      %58 = arith.divf %57, %36 : f32
      %59 = arith.mulf %56, %51 : f32
      %60 = arith.addf %58, %59 : f32
      %61 = math.sqrt %45 : f32
      %62 = arith.divf %61, %36 : f32
      %63 = math.sqrt %51 : f32
      %64 = tpu.iota {dimensions = array<i32: 1>} : vector<8x128xi32>
      %c0_i32_30 = arith.constant 0 : i32
      %65 = vector.broadcast %c0_i32_30 : i32 to vector<8x128xi32>
      %66 = arith.cmpi eq, %64, %65 : vector<8x128xi32>
      %c1_i32 = arith.constant 1 : i32
      %67 = vector.broadcast %c1_i32 : i32 to vector<8x128xi32>
      %68 = arith.cmpi eq, %64, %67 : vector<8x128xi32>
      %c2_i32_31 = arith.constant 2 : i32
      %69 = vector.broadcast %c2_i32_31 : i32 to vector<8x128xi32>
      %70 = arith.cmpi eq, %64, %69 : vector<8x128xi32>
      %cst_32 = arith.constant 0.000000e+00 : f32
      %71 = vector.broadcast %63 : f32 to vector<8x128xf32>
      %72 = vector.broadcast %cst_32 : f32 to vector<8x128xf32>
      %73 = arith.select %70, %71, %72 : vector<8x128xi1>, vector<8x128xf32>
      %74 = vector.broadcast %62 : f32 to vector<8x128xf32>
      %75 = arith.select %68, %74, %73 : vector<8x128xi1>, vector<8x128xf32>
      %76 = vector.broadcast %60 : f32 to vector<8x128xf32>
      %77 = arith.select %66, %76, %75 : vector<8x128xi1>, vector<8x128xf32>
      %c0_33 = arith.constant 0 : index
      %c0_34 = arith.constant 0 : index
      %78 = vector.load %arg8[%c0_33, %c0_34] : memref<8x128xf32, #tpu.memory_space<vmem>>, vector<8x128xf32>
      tpu.vector_store %arg8[%c0_33, %c0_34], %77 {strides = array<i32>} : memref<8x128xf32, #tpu.memory_space<vmem>>, vector<8x128xf32>,
    } else {
    }
    return
  }
  func.func @transform_0(%arg0: i32, %arg1: i32) -> i32 {
    %c0_i32 = arith.constant 0 : i32
    %c0_i32_0 = arith.constant 0 : i32
    return %c0_i32 : i32
  }
  func.func @transform_1(%arg0: i32, %arg1: i32) -> i32 {
    %c0_i32 = arith.constant 0 : i32
    %c0_i32_0 = arith.constant 0 : i32
    return %c0_i32 : i32
  }
  func.func @transform_2(%arg0: i32, %arg1: i32) -> (i32, i32) {
    %c0_i32 = arith.constant 0 : i32
    %c0_i32_0 = arith.constant 0 : i32
    %c0_i32_1 = arith.constant 0 : i32
    return %c0_i32, %c0_i32_0 : i32, i32
  }
  func.func @transform_3(%arg0: i32, %arg1: i32) -> (i32, i32) {
    %c0_i32 = arith.constant 0 : i32
    %c0_i32_0 = arith.constant 0 : i32
    %c0_i32_1 = arith.constant 0 : i32
    return %c0_i32, %c0_i32_0 : i32, i32
  }
  func.func @transform_4(%arg0: i32, %arg1: i32) -> (i32, i32) {
    %c0_i32 = arith.constant 0 : i32
    return %arg0, %arg1 : i32, i32
  }
  func.func @transform_5(%arg0: i32, %arg1: i32) -> (i32, i32) {
    %c0_i32 = arith.constant 0 : i32
    return %arg0, %arg1 : i32, i32
  }
  func.func @transform_6(%arg0: i32, %arg1: i32) -> (i32, i32) {
    %c0_i32 = arith.constant 0 : i32
    %c0_i32_0 = arith.constant 0 : i32
    %c0_i32_1 = arith.constant 0 : i32
    return %c0_i32, %c0_i32_0 : i32, i32
  }
}

</mosaic_0001>

<bundles_post_ra>
// kernel: tpu_custom_call.1
= control target key start
LH: loop header
LB: loop body
LE: loop exit
PB: predicated region body
PF: predicated region fallthrough
CT: control target
= control target key end

     0   :  { %12 = vsyncpa [#allocation7], 0  ;;  %s497_s0 = inlined_call_operand.<no memory space> [shape: f32[1], index: 0, kind: input, shape index: {}]   ;;  %s498_s1 = inlined_call_operand.hbm [shape: s32[3], index: 1, kind: input, shape index: {}]   ;;  %s499_s2 = inlined_call_operand.hbm [shape: f32[2,1], index: 2, kind: input, shape index: {}]   ;;  %s500_s3 = inlined_call_operand.hbm [shape: f32[2,1], index: 3, kind: input, shape index: {}]   ;;  %s501_s4 = inlined_call_operand.hbm [shape: f32[2,24], index: 4, kind: input, shape index: {}]   ;;  %s502_s5 = inlined_call_operand.hbm [shape: f32[2,24], index: 5, kind: input, shape index: {}]   ;;  %s503_s6 = inlined_call_operand.hbm [shape: f32[8,128], index: 6, kind: output, shape index: {}]  }
   0x1   :  { %13 = vsyncpa [#allocation5], 0 }
   0x2   :  { %14 = vsyncpa [#allocation10], 0 }
   0x3   :  { %15 = vsyncpa [#allocation13], 0 }
   0x4   :  { %16 = vsyncpa [#allocation6], 0  ;;  %s242_s23 = scalar_lea.hbm %s498_s1, 16 }
   0x5   :  { %p243_p0 = scmp.ne.s32.totalorder %s498_s1, %s242_s23  ;;  %p246_p1 = scmp.lt.u32.totalorder %s242_s23, %s498_s1 }
   0x7   :  { %p248_p2 = pnand %p246_p1, %p243_p0 }
   0x9   :  { %251 = shalt.err (!%p248_p2)
}
   0xa   :  { %s372_s28 = smov [#allocation4]   ;;  %s373_s7 = smov [#allocation8]  }
   0xb   :  { %26 = dma.hbm_to_smem %s498_s1, 16, %s372_s28, [#allocation7]  }
   0xc   :  { %s33_s8 = sshll.u32 %s373_s7, 4  ;;  %s374_s9 = smov [#allocation9]   ;;  %s34_s8 = int_to_ptr.vmem [resolvable:$true] %s33_s8 }
   0xd   :  { %s43_s10 = sshll.u32 %s374_s9, 4  ;;  %s252_s13 = scalar_lea.hbm %s499_s2, 32  ;;  %s44_s10 = int_to_ptr.vmem [resolvable:$true] %s43_s10 }
   0xe   :  { %p253_p3 = scmp.ne.s32.totalorder %s499_s2, %s252_s13  ;;  %p256_p4 = scmp.lt.u32.totalorder %s252_s13, %s499_s2 }
  0x10   :  { %p258_p5 = pnand %p256_p4, %p253_p3 }
  0x12   :  { %261 = shalt.err (!%p258_p5)
}
  0x13   :  { %s262_s1 = scalar_lea.vmem %s34_s8, 32  ;;  %p267_p7 = scmp.lt.s32.totalorder %s34_s8, %s34_s8 }
  0x14   :  { %p263_p6 = scmp.ne.s32.totalorder %s34_s8, %s262_s1  ;;  %p268_p8 = scmp.lt.s32.totalorder %s262_s1, %s262_s1 }
  0x16   :  { %p269_p9 = por %p268_p8, %p267_p7 }
  0x18   :  { %p270_p10 = pnand %p269_p9, %p263_p6 }
  0x1a   :  { %273 = shalt.err (!%p270_p10)
}
  0x1b   :  { %36 = dma.hbm_to_vmem [thread:$0]  %s499_s2, 32, %s34_s8, [#allocation5]  }
  0x1c   :  { %s274_s22 = scalar_lea.hbm %s500_s3, 32 }
  0x1d   :  { %p275_p11 = scmp.ne.s32.totalorder %s500_s3, %s274_s22  ;;  %p278_p12 = scmp.lt.u32.totalorder %s274_s22, %s500_s3 }
  0x1f   :  { %p280_p13 = pnand %p278_p12, %p275_p11 }
  0x21   :  { %283 = shalt.err (!%p280_p13)
}
  0x22   :  { %s284_s27 = scalar_lea.vmem %s44_s10, 32  ;;  %p289_p1 = scmp.lt.s32.totalorder %s44_s10, %s44_s10 }
  0x23   :  { %p285_p0 = scmp.ne.s32.totalorder %s44_s10, %s284_s27  ;;  %p290_p2 = scmp.lt.s32.totalorder %s284_s27, %s284_s27 }
  0x25   :  { %p291_p3 = por %p290_p2, %p289_p1 }
  0x27   :  { %p292_p4 = pnand %p291_p3, %p285_p0 }
  0x29   :  { %295 = shalt.err (!%p292_p4)
}
  0x2a   :  { %46 = dma.hbm_to_vmem [thread:$0]  %s500_s3, 32, %s44_s10, [#allocation10]  }
  0x2b   :  { %51 = vsyncadd [#allocation10], 96  ;;  %s375_s29 = smov [#allocation11]   ;;  %s296_s9 = scalar_lea.hbm %s501_s4, 32 }
  0x2c   :  { %s52_s30 = sshll.u32 %s375_s29, 4  ;;  %p297_p5 = scmp.ne.s32.totalorder %s501_s4, %s296_s9  ;;  %s53_s30 = int_to_ptr.vmem [resolvable:$true] %s52_s30 }
  0x2d   :  { %p300_p6 = scmp.lt.u32.totalorder %s296_s9, %s501_s4 }
  0x2f   :  { %p302_p7 = pnand %p300_p6, %p297_p5 }
  0x31   :  { %305 = shalt.err (!%p302_p7)
}
  0x32   :  { %s306_s15 = scalar_lea.vmem %s53_s30, 32  ;;  %s310_s3 = scalar_lea.vmem %s53_s30, 128 }
  0x33   :  { %p307_p8 = scmp.ne.s32.totalorder %s53_s30, %s306_s15  ;;  %p311_p9 = scmp.lt.s32.totalorder %s53_s30, %s53_s30 }
  0x34   :  { %p312_p10 = scmp.lt.s32.totalorder %s310_s3, %s306_s15 }
  0x36   :  { %p313_p11 = por %p312_p10, %p311_p9 }
  0x38   :  { %p314_p12 = pnand %p313_p11, %p307_p8 }
  0x3a   :  { %317 = shalt.err (!%p314_p12)
}
  0x3b   :  { %s376_s10 = smov 32   ;;  %s377_s16 = smov 2  }
  0x3c   :  { %58 = dma.hbm_to_vmem [thread:$0]  %s501_s4, 32, %s53_s30, [#allocation10], %s376_s10, %s376_s10, %s377_s16  }
  0x3d   :  { %63 = vsyncadd [#allocation13], 96  ;;  %s378_s18 = smov [#allocation12]   ;;  %s318_s22 = scalar_lea.hbm %s502_s5, 32 }
  0x3e   :  { %s64_s19 = sshll.u32 %s378_s18, 4  ;;  %p319_p13 = scmp.ne.s32.totalorder %s502_s5, %s318_s22  ;;  %s65_s19 = int_to_ptr.vmem [resolvable:$true] %s64_s19 }
  0x3f   :  { %p322_p0 = scmp.lt.u32.totalorder %s318_s22, %s502_s5 }
  0x41   :  { %p324_p1 = pnand %p322_p0, %p319_p13 }
  0x43   :  { %327 = shalt.err (!%p324_p1)
}
  0x44   :  { %s328_s27 = scalar_lea.vmem %s65_s19, 32  ;;  %s332_s4 = scalar_lea.vmem %s65_s19, 128 }
  0x45   :  { %p329_p2 = scmp.ne.s32.totalorder %s65_s19, %s328_s27  ;;  %p333_p3 = scmp.lt.s32.totalorder %s65_s19, %s65_s19 }
  0x46   :  { %p334_p4 = scmp.lt.s32.totalorder %s332_s4, %s328_s27 }
  0x48   :  { %p335_p5 = por %p334_p4, %p333_p3 }
  0x4a   :  { %p336_p6 = pnand %p335_p5, %p329_p2 }
  0x4c   :  { %339 = shalt.err (!%p336_p6)
}
  0x4d   :  { %70 = dma.hbm_to_vmem [thread:$0]  %s502_s5, 32, %s65_s19, [#allocation13], %s376_s10, %s376_s10, %s377_s16  }
  0x4e   :  { %362 = dma.done.wait [#allocation7], 16  }
  0x4f   :  { %363 = vsyncadd [#allocation7], 4294967280 }
  0x50   :  { %364 = dma.done.wait [#allocation5], 32  }
  0x51   :  { %365 = vsyncadd [#allocation5], 4294967264 }
  0x52   :  { %366 = dma.done.wait [#allocation10], 160  }
  0x53   :  { %367 = vsyncadd [#allocation10], 4294967136 }
  0x54   :  { %368 = dma.done.wait [#allocation13], 128  }
  0x55   :  { %369 = vsyncadd [#allocation13], 4294967168 }
  0x56   :  { %86 = sfence }
  0x57   :  { %v126_v0 = vld [vmem:[#allocation8] sm:$0x3]  ;;  %v127_v1 = vld [vmem:[#allocation9] sm:$0x3]  ;;  %v98_v2 = vlaneseq  ;;  %v379_v4 = vmov 0.0   ;;  %v94_v5 = vld [vmem:[#allocation11] sm:$0xff] }
  0x58   :  { %v128_v3 = vsub.f32 %v126_v0, %v127_v1  ;;  %93 = vst [vmem:[#allocation2] sm:$0x1] %v379_v4  ;;  %v95_v6 = vld [vmem:[#allocation12] sm:$0xff]  ;;  %vm130_vm0 = vcmask 1024   ;;  %vm143_vm4 = vcmask 1040384   ;;  %s124_s5 = sld [smem:[#allocation4]] }
  0x59   :  { %v96_v7 = vsub.f32 %v94_v5, %v95_v6  ;;  %v99_v8 = vshrl.u32 %v98_v2, 7  ;;  %v476_v9 = vand.u32 127, %v98_v2  ;;  %s155_s11 = smul.f32 1000.0, %s497_s0  ;;  %s380_s22 = smov [#allocation14]  }
  0x5a   :  { %v129_v10 = vmul.f32 %v128_v3, %v128_v3  ;;  %s205_s23 = sshll.u32 %s380_s22, 4  ;;  %s206_s23 = int_to_ptr.vmem [resolvable:$true] %s205_s23 }
  0x5b   :  { %vm102_vm1 = vcmp.lt.s32.totalorder %v99_v8, 2  ;;  %vm108_vm2 = vcmp.lt.s32.totalorder %v476_v9, 24  ;;  %s156_s12 = smul.f32 -0.98, %s155_s11  ;;  %vm191_vm9 = vcmp.eq.s32.totalorder %v476_v9, 2  ;;  %vm190_vm10 = vcmp.eq.s32.totalorder %v476_v9, 1  ;;  %p345_p8 = scmp.lt.s32.totalorder %s206_s23, %s206_s23 }
  0x5c   :  { %v131_v11 = vsel %vm130_vm0, %v129_v10, 0.0  ;;  %vm109_vm3 = vmand %vm102_vm1, %vm108_vm2  ;;  %s158_s13 = smul.f32 999.0, %s155_s11  ;;  %vm189_vm11 = vcmp.eq.s32.totalorder %v476_v9, 0  ;;  %s340_s24 = scalar_lea.vmem %s206_s23, 128 }
  0x5d   :  { %132 = vadd.xlane.f32.xlu0 %v131_v11  ;;  %v110_v12 = vsel %vm109_vm3, %v96_v7, 0.0  ;;  %s157_s14 = sadd.f32 1.0, %s156_s12  ;;  %p341_p7 = scmp.ne.s32.totalorder %s206_s23, %s340_s24 }
  0x5e   :  { %v112_v13 = vmul.f32 %v110_v12, %v110_v12  ;;  %s125_s29 = scvt.s32.f32 %s124_s5  ;;  %s159_s15 = sadd.f32 1.0, %s158_s13 }
  0x5f   :  { %v111_v19 = vld [vmem:[#allocation2] sm:$0x1]  ;;  %p346_p9 = scmp.lt.s32.totalorder %s340_s24, %s340_s24 }
  0x60   :  { %v113_v14 = vrot.slane %v112_v13, 4  ;;  %v161_v31 = vstv %s125_s29 }
  0x61   :  { %236 = vrcp.f32 %v161_v31  ;;  %p347_p10 = por %p346_p9, %p345_p8 }
  0x62   :  { %v114_v15 = vadd.f32 %v113_v14, %v112_v13 }
  0x63   :  { %p348_p11 = pnand %p347_p10, %p341_p7 }
  0x64   :  { %v115_v16 = vrot.slane %v114_v15, 2 }
  0x66   :  { %v116_v17 = vadd.f32 %v115_v16, %v114_v15 }
  0x68   :  { %v117_v18 = vrot.slane %v116_v17, 1 }
  0x6a   :  { %v118_v20 = vadd.f32 %v117_v18, %v116_v17 }
  0x6b   :  { %v237_v38 = vpop.eup %236 }
  0x6c   :  { %v119_v21 = vadd.f32 %v118_v20, %v111_v19 }
  0x6e   :  { %120 = vst [vmem:[#allocation2] sm:$0x1] %v119_v21 }
  0x75   :  { %v142_v22 = vld [vmem:[#allocation2] sm:$0x1] }
  0x76   :  { %v144_v23 = vsel %vm143_vm4, %v142_v22, 0.0 }
  0x77   :  { %145 = vadd.xlane.f32.xlu0 %v144_v23 }
  0xea   :  { %v133_v24 = vpop.xlane.xlu0 %132 }
  0xeb   :  { %v134_v25 = vrot.slane %v133_v24, 4 }
  0xed   :  { %v135_v26 = vadd.f32 %v134_v25, %v133_v24 }
  0xef   :  { %v136_v27 = vrot.slane %v135_v26, 2 }
  0xf1   :  { %v137_v28 = vadd.f32 %v136_v27, %v135_v26 }
  0xf3   :  { %v138_v29 = vrot.slane %v137_v28, 1 }
  0xf5   :  { %v139_v30 = vadd.f32 %v138_v29, %v137_v28 }
  0xf7   :  { %217 = vpush %v139_v30 }
 0x104   :  { %v146_v32 = vpop.xlane.xlu0 %145 }
 0x105   :  { %v147_v33 = vrot.slane %v146_v32, 4 }
 0x107   :  { %v148_v34 = vadd.f32 %v147_v33, %v146_v32 }
 0x109   :  { %v149_v35 = vrot.slane %v148_v34, 2 }
 0x10b   :  { %v150_v36 = vadd.f32 %v149_v35, %v148_v34 }
 0x10d   :  { %v151_v37 = vrot.slane %v150_v36, 1 }
 0x10f   :  { %v152_v39 = vadd.f32 %v151_v37, %v150_v36 }
 0x111   :  { %219 = vpush %v152_v39 }
 0x112   :  { %221 = vpush %v237_v38 }
 0x128   :  { %s218_s30 = spop %217 }
 0x129   :  { %s141_s7 = smul.f32 0.5, %s218_s30 }
 0x12b   :  { %v167_v40 = vstv %s141_s7  ;;  %s160_s3 = smul.f32 %s157_s14, %s141_s7 }
 0x12c   :  { %238 = vrsqrt.f32 %v167_v40  ;;  %vm170_vm5 = vcmp.eq.f32.partialorder %v167_v40, inf  ;;  %v173_v42 = vand.u32 2147483648, %v167_v40  ;;  %vm172_vm6 = vcmp.eq.f32.partialorder %v167_v40, 0.0 }
 0x136   :  { %v239_v41 = vpop.eup %238 }
 0x137   :  { %v169_v43 = vmul.f32 %v239_v41, %v167_v40 }
 0x139   :  { %v171_v44 = vsel %vm170_vm5, %v167_v40, %v169_v43 }
 0x13a   :  { %v174_v45 = vsel %vm172_vm6, %v173_v42, %v171_v44 }
 0x13b   :  { %223 = vpush %v174_v45 }
 0x142   :  { %s220_s10 = spop %219 }
 0x143   :  { %s154_s16 = smul.f32 0.020833334, %s220_s10  ;;  %s222_s17 = spop %221 }
 0x144   :  { %s164_s1 = smul.f32 %s222_s17, %s160_s3 }
 0x145   :  { %s165_s18 = smul.f32 %s159_s15, %s154_s16  ;;  %v180_v46 = vstv %s154_s16 }
 0x146   :  { %240 = vrsqrt.f32 %v180_v46  ;;  %vm183_vm7 = vcmp.eq.f32.partialorder %v180_v46, inf  ;;  %v186_v49 = vand.u32 2147483648, %v180_v46  ;;  %vm185_vm8 = vcmp.eq.f32.partialorder %v180_v46, 0.0 }
 0x147   :  { %s166_s0 = sadd.f32 %s165_s18, %s164_s1 }
 0x149   :  { %v196_v56 = vstv %s166_s0 }
 0x150   :  { %v241_v47 = vpop.eup %240 }
 0x151   :  { %v182_v48 = vmul.f32 %v241_v47, %v180_v46 }
 0x153   :  { %v184_v50 = vsel %vm183_vm7, %v180_v46, %v182_v48 }
 0x154   :  { %v187_v51 = vsel %vm185_vm8, %v186_v49, %v184_v50 }
 0x155   :  { %225 = vpush %v187_v51 }
 0x16c   :  { %s224_s19 = spop %223 }
 0x16d   :  { %s179_s20 = smul.f32 %s224_s19, %s222_s17 }
 0x16f   :  { %v194_v53 = vstv %s179_s20 }
 0x186   :  { %s226_s21 = spop %225 }
 0x187   :  { %v192_v52 = vstv %s226_s21 }
 0x188   :  { %v193_v54 = vsel %vm191_vm9, %v192_v52, 0.0 }
 0x189   :  { %v195_v55 = vsel %vm190_vm10, %v194_v53, %v193_v54 }
 0x18a   :  { %v197_v57 = vsel %vm189_vm11, %v196_v56, %v195_v55 }
 0x18b   :  { %198 = vst [vmem:[#allocation14] sm:$0xff] %v197_v57 }
 0x18c   :  { %351 = shalt.err (!%p348_p11)
}
 0x18d   :  { %s352_s27 = scalar_lea.hbm %s503_s6, 128 }
 0x18e   :  { %p353_p12 = scmp.ne.s32.totalorder %s503_s6, %s352_s27  ;;  %p356_p13 = scmp.lt.u32.totalorder %s352_s27, %s503_s6 }
 0x190   :  { %p358_p0 = pnand %p356_p13, %p353_p12 }
 0x192   :  { %361 = shalt.err (!%p358_p0)
}
 0x193   :  { %208 = dma.vmem_to_hbm [thread:$0]  %s206_s23, 128, %s503_s6, [#allocation6]  }
 0x194   :  { %370 = dma.done.wait [#allocation6], 128  }
 0x195   :  { %371 = vsyncadd [#allocation6], 4294967168 }
 0x196   :  { %212 = vsyncpa [#allocation5], 1 }
 0x197   :  { %213 = vsyncpa [#allocation10], 1 }
 0x198   :  { %214 = vsyncpa [#allocation13], 1 }
 0x199   :  { %215 = vsyncpa [#allocation6], 1 }
 0x19a   :  { %216 = vsyncpa [#allocation7], 1 }

</bundles_post_ra>
